<compile_context>
chip_gen: v5e
topology: v5e:2x2
jax: 0.10.0
libtpu: 0.0.40
codegen_flags: <defaults>
</compile_context>

<pallas_src>
import functools

import jax
import jax.numpy as jnp
from jax.experimental import pallas as pl
from jax.experimental.pallas import tpu as pltpu


def _round_up(x, m):
    return (x + m - 1) // m * m


def perceptron_kernel(x_ref, w_ref, b_ref, o_ref, *, acc_prec):
    """Fused MLP on one batch tile.

    x_ref: [TILE_B, D]   (D = padded feature dim, multiple of 128)
    w_ref: [3, D, D]     packed, zero-padded weights (resident in VMEM)
    b_ref: [3, 1, D]     packed, zero-padded biases  (resident in VMEM)
    o_ref: [TILE_B, D]
    """
    x = x_ref[...]
    dot_dtype = x.dtype

    # Layer 1
    h = jnp.dot(x, w_ref[0], preferred_element_type=jnp.float32,
                precision=acc_prec)
    h = jnp.maximum(h + b_ref[0], 0.0)
    # Layer 2
    h = jnp.dot(h.astype(dot_dtype), w_ref[1],
                preferred_element_type=jnp.float32, precision=acc_prec)
    h = jnp.maximum(h + b_ref[1], 0.0)
    # Layer 3
    h = jnp.dot(h.astype(dot_dtype), w_ref[2],
                preferred_element_type=jnp.float32, precision=acc_prec)
    o_ref[...] = jnp.maximum(h + b_ref[2], 0.0).astype(o_ref.dtype)


def perceptron_net(x, params, *, tile_b=256, use_bf16=False):
    """x: [B, N] float32. params: dict of pre-transposed weights/biases."""
    B, N = x.shape
    H = 2 * N
    D = _round_up(max(N, H), 128)          # lane-dense padded feature dim

    f32 = jnp.float32
    dot_dtype = jnp.bfloat16 if use_bf16 else f32
    acc_prec = None if use_bf16 else jax.lax.Precision.HIGHEST

    # --- pack + zero-pad weights [3, D, D] and biases [3, 1, D] -------------
    def pad_w(w):                           # w: [in, out]
        return (jnp.zeros((D, D), dot_dtype)
                .at[: w.shape[0], : w.shape[1]].set(w.astype(dot_dtype)))

    def pad_b(b):                           # b: [1, out]
        return jnp.zeros((1, D), f32).at[:, : b.shape[1]].set(b.astype(f32))

    w_packed = jnp.stack(
        [pad_w(params["w1"]), pad_w(params["w2"]), pad_w(params["w3"])])
    b_packed = jnp.stack(
        [pad_b(params["b1"]), pad_b(params["b2"]), pad_b(params["b3"])])

    # --- batch tiling: sublane-aligned, capped so h stays in vregs ----------
    tb = min(tile_b, _round_up(B, 8))
    B_pad = _round_up(B, tb)
    x_pad = (jnp.zeros((B_pad, D), dot_dtype)
             .at[:B, :N].set(x.astype(dot_dtype)))

    out = pl.pallas_call(
        functools.partial(perceptron_kernel, acc_prec=acc_prec),
        out_shape=jax.ShapeDtypeStruct((B_pad, D), jnp.float32),
        grid=(B_pad // tb,),
        in_specs=[
            pl.BlockSpec((tb, D), lambda i: (i, 0)),        # x: tiled on batch
            pl.BlockSpec((3, D, D), lambda i: (0, 0, 0)),   # weights: resident
            pl.BlockSpec((3, 1, D), lambda i: (0, 0, 0)),   # biases: resident
        ],
        out_specs=pl.BlockSpec((tb, D), lambda i: (i, 0)),
        compiler_params=pltpu.CompilerParams(
            dimension_semantics=("parallel",)),
    )(x_pad, w_packed, b_packed)

    # slice away batch + lane padding
    return out[:B, :N].astype(x.dtype)


def init_params(key, N):
    """Deterministic init mirroring torch.nn.Linear default
    (U[-1/sqrt(in), 1/sqrt(in)]). Weights stored as [in, out]."""
    ks = jax.random.split(key, 6)

    def linear(kw, kb, fan_in, fan_out):
        bound = 1.0 / jnp.sqrt(fan_in)
        w = jax.random.uniform(kw, (fan_in, fan_out), jnp.float32, -bound, bound)
        b = jax.random.uniform(kb, (1, fan_out), jnp.float32, -bound, bound)
        return w, b

    w1, b1 = linear(ks[0], ks[1], N, 2 * N)
    w2, b2 = linear(ks[2], ks[3], 2 * N, 2 * N)
    w3, b3 = linear(ks[4], ks[5], 2 * N, N)
    return dict(w1=w1, b1=b1, w2=w2, b2=b2, w3=w3, b3=b3)


def perceptron_ref(x, p):
    hi = jax.lax.Precision.HIGHEST
    h = jnp.maximum(jnp.dot(x, p["w1"], precision=hi) + p["b1"], 0.0)
    h = jnp.maximum(jnp.dot(h, p["w2"], precision=hi) + p["b2"], 0.0)
    return jnp.maximum(jnp.dot(h, p["w3"], precision=hi) + p["b3"], 0.0)


if __name__ == "__main__":
    B, N = 8, 32  # small batch, feature dim N (module hidden = 2N = 64)
    key = jax.random.PRNGKey(0)
    kx, kp = jax.random.split(key)
    x = jax.random.normal(kx, (B, N), jnp.float32)
    params = init_params(kp, N)

    out = jax.block_until_ready(perceptron_net(x, params))
    ref = perceptron_ref(x, params)
    assert out.shape == (B, N)
    assert jnp.allclose(out, ref, atol=1e-5, rtol=1e-5)
    print("KERNEL_OK")
</pallas_src>

<mosaic_0001>
module attributes {stable_mosaic.version = 11 : i64} {
  func.func @perceptron_kernel(%arg0: i32, %arg1: memref<8x128xf32, #tpu.memory_space<vmem>>, %arg2: memref<3x128x128xf32, #tpu.memory_space<vmem>>, %arg3: memref<3x1x128xf32, #tpu.memory_space<vmem>>, %arg4: memref<8x128xf32, #tpu.memory_space<vmem>>) attributes {dimension_semantics = [#tpu.dimension_semantics<parallel>], iteration_bounds = array<i64: 1>, scalar_prefetch = 0 : i64, scratch_operands = 0 : i64, tpu.core_type = #tpu.core_type<tc>, window_params = [{transform_indices = @transform_0, window_bounds = array<i64: 8, 128>}, {pipeline_mode = #tpu.pipeline_mode<synchronous>, transform_indices = @transform_1, window_bounds = array<i64: 3, 128, 128>}, {pipeline_mode = #tpu.pipeline_mode<synchronous>, transform_indices = @transform_2, window_bounds = array<i64: 3, 1, 128>}, {transform_indices = @transform_3, window_bounds = array<i64: 8, 128>}]} {
    %c0 = arith.constant 0 : index
    %c0_0 = arith.constant 0 : index
    %0 = vector.load %arg1[%c0, %c0_0] : memref<8x128xf32, #tpu.memory_space<vmem>>, vector<8x128xf32>
    %c0_1 = arith.constant 0 : index
    %c0_2 = arith.constant 0 : index
    %c0_3 = arith.constant 0 : index
    %1 = vector.load %arg2[%c0_1, %c0_2, %c0_3] : memref<3x128x128xf32, #tpu.memory_space<vmem>>, vector<1x128x128xf32>
    %2 = vector.shape_cast %1 : vector<1x128x128xf32> to vector<128x128xf32>
    %cst = arith.constant dense<0.000000e+00> : vector<8x128xf32>
    %3 = tpu.matmul %0, %2, %cst {dimension_numbers = #tpu.dot_dimension_numbers<[1], [0], [0], [1], [0, 0, 1, 1], [], []>, precision = #tpu.contract_precision<fp32>} : vector<8x128xf32>, vector<128x128xf32>, vector<8x128xf32> -> vector<8x128xf32>
    %c0_4 = arith.constant 0 : index
    %c0_5 = arith.constant 0 : index
    %c0_6 = arith.constant 0 : index
    %4 = vector.load %arg3[%c0_4, %c0_5, %c0_6] : memref<3x1x128xf32, #tpu.memory_space<vmem>>, vector<1x1x128xf32>
    %5 = vector.shape_cast %4 : vector<1x1x128xf32> to vector<1x128xf32>
    %6 = vector.broadcast %5 : vector<1x128xf32> to vector<8x128xf32>
    %7 = arith.addf %3, %6 : vector<8x128xf32>
    %cst_7 = arith.constant 0.000000e+00 : f32
    %8 = vector.broadcast %cst_7 : f32 to vector<8x128xf32>
    %9 = arith.maximumf %7, %8 : vector<8x128xf32>
    %c1 = arith.constant 1 : index
    %c0_8 = arith.constant 0 : index
    %c0_9 = arith.constant 0 : index
    %10 = vector.load %arg2[%c1, %c0_8, %c0_9] : memref<3x128x128xf32, #tpu.memory_space<vmem>>, vector<1x128x128xf32>
    %11 = vector.shape_cast %10 : vector<1x128x128xf32> to vector<128x128xf32>
    %cst_10 = arith.constant dense<0.000000e+00> : vector<8x128xf32>
    %12 = tpu.matmul %9, %11, %cst_10 {dimension_numbers = #tpu.dot_dimension_numbers<[1], [0], [0], [1], [0, 0, 1, 1], [], []>, precision = #tpu.contract_precision<fp32>} : vector<8x128xf32>, vector<128x128xf32>, vector<8x128xf32> -> vector<8x128xf32>
    %c1_11 = arith.constant 1 : index
    %c0_12 = arith.constant 0 : index
    %c0_13 = arith.constant 0 : index
    %13 = vector.load %arg3[%c1_11, %c0_12, %c0_13] : memref<3x1x128xf32, #tpu.memory_space<vmem>>, vector<1x1x128xf32>
    %14 = vector.shape_cast %13 : vector<1x1x128xf32> to vector<1x128xf32>
    %15 = vector.broadcast %14 : vector<1x128xf32> to vector<8x128xf32>
    %16 = arith.addf %12, %15 : vector<8x128xf32>
    %cst_14 = arith.constant 0.000000e+00 : f32
    %17 = vector.broadcast %cst_14 : f32 to vector<8x128xf32>
    %18 = arith.maximumf %16, %17 : vector<8x128xf32>
    %c2 = arith.constant 2 : index
    %c0_15 = arith.constant 0 : index
    %c0_16 = arith.constant 0 : index
    %19 = vector.load %arg2[%c2, %c0_15, %c0_16] : memref<3x128x128xf32, #tpu.memory_space<vmem>>, vector<1x128x128xf32>
    %20 = vector.shape_cast %19 : vector<1x128x128xf32> to vector<128x128xf32>
    %cst_17 = arith.constant dense<0.000000e+00> : vector<8x128xf32>
    %21 = tpu.matmul %18, %20, %cst_17 {dimension_numbers = #tpu.dot_dimension_numbers<[1], [0], [0], [1], [0, 0, 1, 1], [], []>, precision = #tpu.contract_precision<fp32>} : vector<8x128xf32>, vector<128x128xf32>, vector<8x128xf32> -> vector<8x128xf32>
    %c2_18 = arith.constant 2 : index
    %c0_19 = arith.constant 0 : index
    %c0_20 = arith.constant 0 : index
    %22 = vector.load %arg3[%c2_18, %c0_19, %c0_20] : memref<3x1x128xf32, #tpu.memory_space<vmem>>, vector<1x1x128xf32>
    %23 = vector.shape_cast %22 : vector<1x1x128xf32> to vector<1x128xf32>
    %24 = vector.broadcast %23 : vector<1x128xf32> to vector<8x128xf32>
    %25 = arith.addf %21, %24 : vector<8x128xf32>
    %cst_21 = arith.constant 0.000000e+00 : f32
    %26 = vector.broadcast %cst_21 : f32 to vector<8x128xf32>
    %27 = arith.maximumf %25, %26 : vector<8x128xf32>
    %c0_22 = arith.constant 0 : index
    %c0_23 = arith.constant 0 : index
    %28 = vector.load %arg4[%c0_22, %c0_23] : memref<8x128xf32, #tpu.memory_space<vmem>>, vector<8x128xf32>
    tpu.vector_store %arg4[%c0_22, %c0_23], %27 {strides = array<i32>} : memref<8x128xf32, #tpu.memory_space<vmem>>, vector<8x128xf32>,
    return
  }
  func.func @transform_0(%arg0: i32) -> (i32, i32) {
    %c0_i32 = arith.constant 0 : i32
    %c0_i32_0 = arith.constant 0 : i32
    return %arg0, %c0_i32 : i32, i32
  }
  func.func @transform_1(%arg0: i32) -> (i32, i32, i32) {
    %c0_i32 = arith.constant 0 : i32
    %c0_i32_0 = arith.constant 0 : i32
    %c0_i32_1 = arith.constant 0 : i32
    %c0_i32_2 = arith.constant 0 : i32
    return %c0_i32, %c0_i32_0, %c0_i32_1 : i32, i32, i32
  }
  func.func @transform_2(%arg0: i32) -> (i32, i32, i32) {
    %c0_i32 = arith.constant 0 : i32
    %c0_i32_0 = arith.constant 0 : i32
    %c0_i32_1 = arith.constant 0 : i32
    %c0_i32_2 = arith.constant 0 : i32
    return %c0_i32, %c0_i32_0, %c0_i32_1 : i32, i32, i32
  }
  func.func @transform_3(%arg0: i32) -> (i32, i32) {
    %c0_i32 = arith.constant 0 : i32
    %c0_i32_0 = arith.constant 0 : i32
    return %arg0, %c0_i32 : i32, i32
  }
}

</mosaic_0001>

<bundles_post_ra>
// kernel: tpu_custom_call.1
= control target key start
LH: loop header
LB: loop body
LE: loop exit
PB: predicated region body
PF: predicated region fallthrough
CT: control target
= control target key end

     0   :  { %8 = vsyncpa [#allocation3], 0  ;;  %s2004_s0 = inlined_call_operand.hbm [shape: f32[8,128], index: 0, kind: input, shape index: {}]   ;;  %s2005_s1 = inlined_call_operand.hbm [shape: f32[3,128,128], index: 1, kind: input, shape index: {}]   ;;  %s2006_s2 = inlined_call_operand.hbm [shape: f32[3,1,128], index: 2, kind: input, shape index: {}]   ;;  %s2007_s3 = inlined_call_operand.hbm [shape: f32[8,128], index: 3, kind: output, shape index: {}]  }
   0x1   :  { %9 = vsyncpa [#allocation6], 0  ;;  %s26_s14 = sshll.u32 %s2005_s1, 4  ;;  %s27_s14 = int_to_ptr.hbm [resolvable:$true] %s26_s14 }
   0x2   :  { %10 = vsyncpa [#allocation4], 0  ;;  %s1283_s15 = smov [#allocation5]   ;;  %s16_s19 = sshll.u32 %s2004_s0, 4  ;;  %s17_s19 = int_to_ptr.hbm [resolvable:$true] %s16_s19 }
   0x3   :  { %s28_s16 = sshll.u32 %s1283_s15, 4  ;;  %s1284_s20 = smov 128   ;;  %s29_s16 = int_to_ptr.vmem [resolvable:$true] %s28_s16 }
   0x4   :  { %s1285_s21 = smov 8   ;;  %s1286_s22 = smov [#allocation2]  }
   0x5   :  { %34 = dma.hbm_to_vmem [thread:$0]  %s27_s14, 6144, %s29_s16, [#allocation6], %s1284_s20, %s1284_s20, %s1285_s21  }
   0x6   :  { %s18_s23 = sshll.u32 %s1286_s22, 4  ;;  %s39_s26 = sshll.u32 %s2006_s2, 4  ;;  %s19_s23 = int_to_ptr.vmem [resolvable:$true] %s18_s23  ;;  %s40_s26 = int_to_ptr.hbm [resolvable:$true] %s39_s26 }
   0x7   :  { %21 = dma.hbm_to_vmem [thread:$0]  %s17_s19, 128, %s19_s23, [#allocation3]  }
   0x8   :  { %s1287_s1 = smov [#allocation7]   ;;  %s1288_s28 = smov 16  }
   0x9   :  { %s41_s27 = sshll.u32 %s1287_s1, 4  ;;  %s1289_s29 = smov 1   ;;  %s42_s27 = int_to_ptr.vmem [resolvable:$true] %s41_s27 }
   0xa   :  { %47 = dma.hbm_to_vmem [thread:$0]  %s40_s26, 48, %s42_s27, [#allocation6], %s1288_s28, %s1288_s28, %s1289_s29  }
   0xb   :  { %1277 = dma.done.wait [#allocation3], 128  }
   0xc   :  { %1278 = vsyncadd [#allocation3], 4294967168 }
   0xd   :  { %1279 = dma.done.wait [#allocation6], 6192  }
   0xe   :  { %1280 = vsyncadd [#allocation6], 4294961104  ;;  %v76_v0 = vld [vmem:[#allocation5 + $0x78] sm:$0xff]  ;;  %v75_v1 = vld [vmem:[#allocation5 + $0x70] sm:$0xff]  ;;  %s1290_s0 = smov [#allocation8]   ;;  %s1159_s5 = sshll.u32 %s2007_s3, 4  ;;  %s1160_s5 = int_to_ptr.hbm [resolvable:$true] %s1159_s5 }
   0xf   :  { %v74_v2 = vld [vmem:[#allocation5 + $0x68] sm:$0xff]  ;;  %v1320_v3 = vand.u32 4294901760, %v76_v0  ;;  %v1322_v4 = vand.u32 4294901760, %v75_v1  ;;  %v73_v6 = vld [vmem:[#allocation5 + $0x60] sm:$0xff]  ;;  %v72_v7 = vld [vmem:[#allocation5 + $0x58] sm:$0xff]  ;;  %s1157_s2 = sshll.u32 %s1290_s0, 4  ;;  %s1158_s2 = int_to_ptr.vmem [resolvable:$true] %s1157_s2 }
  0x10   :  { %v1324_v5 = vand.u32 4294901760, %v74_v2  ;;  %v71_v8 = vld [vmem:[#allocation5 + $0x50] sm:$0xff]  ;;  %v1326_v9 = vand.u32 4294901760, %v73_v6  ;;  %v1328_v10 = vand.u32 4294901760, %v72_v7  ;;  %v70_v12 = vld [vmem:[#allocation5 + $0x48] sm:$0xff]  ;;  %v69_v13 = vld [vmem:[#allocation5 + $0x40] sm:$0xff] }
  0x11   :  { %v1330_v11 = vand.u32 4294901760, %v71_v8  ;;  %82 = vmatpush.msra.mxu0 %v1320_v3  ;;  %v1334_v14 = vsub.f32 %v76_v0, %v1320_v3  ;;  %v1337_v15 = vsub.f32 %v75_v1, %v1322_v4  ;;  %v1342_v17 = vand.u32 4294901760, %v70_v12  ;;  %278 = vmatpush.msra.mxu3 %v1320_v3  ;;  %v68_v21 = vld [vmem:[#allocation5 + $0x38] sm:$0xff]  ;;  %v67_v34 = vld [vmem:[#allocation5 + $0x30] sm:$0xff]  ;;  %v66_v35 = vld [vmem:[#allocation5 + $0x28] sm:$0xff] }
  0x12   :  { %v1340_v16 = vsub.f32 %v74_v2, %v1324_v5  ;;  %v1346_v18 = vsub.f32 %v73_v6, %v1326_v9  ;;  %v1349_v19 = vsub.f32 %v72_v7, %v1328_v10  ;;  %v1351_v20 = vand.u32 4294901760, %v69_v13  ;;  %v65_v42 = vld [vmem:[#allocation5 + $0x20] sm:$0xff]  ;;  %v64_v47 = vld [vmem:[#allocation5 + $0x18] sm:$0xff]  ;;  %v63_v53 = vld [vmem:[#allocation5 + $0x10] sm:$0xff] }
  0x13   :  { %84 = vmatpush.msra.mxu0 %v1322_v4  ;;  %v124_v22 = vand.u32 4294901760, %v1334_v14  ;;  %v130_v23 = vand.u32 4294901760, %v1337_v15  ;;  %v1358_v25 = vsub.f32 %v71_v8, %v1330_v11  ;;  %225 = vmatpush.msra.mxu2 %v1334_v14  ;;  %v1364_v28 = vsub.f32 %v70_v12, %v1342_v17  ;;  %v62_v61 = vld [vmem:[#allocation5 + $0x8] sm:$0xff]  ;;  %v61_v2 = vld [vmem:[#allocation5] sm:$0xff] }
  0x14   :  { %v136_v24 = vand.u32 4294901760, %v1340_v16  ;;  %v142_v26 = vand.u32 4294901760, %v1346_v18  ;;  %v148_v27 = vand.u32 4294901760, %v1349_v19  ;;  %280 = vmatpush.msra.mxu3 %v1322_v4  ;;  %v1377_v32 = vand.u32 4294901760, %v68_v21 }
  0x15   :  { %v125_v29 = vsub.f32 %v1334_v14, %v124_v22  ;;  %86 = vmatpush.msra.mxu0 %v1324_v5  ;;  %v131_v30 = vsub.f32 %v1337_v15, %v130_v23  ;;  %228 = vmatpush.msra.mxu2 %v1337_v15  ;;  %v1381_v33 = vsub.f32 %v69_v13, %v1351_v20  ;;  %v154_v39 = vand.u32 4294901760, %v1358_v25  ;;  %v439_v14 = vld [vmem:[#allocation5 + $0xf8] sm:$0xff] }
  0x16   :  { %v137_v31 = vsub.f32 %v1340_v16, %v136_v24  ;;  %282 = vmatpush.msra.mxu3 %v1324_v5  ;;  %v143_v38 = vsub.f32 %v1346_v18, %v142_v26  ;;  %v149_v40 = vsub.f32 %v1349_v19, %v148_v27  ;;  %v160_v41 = vand.u32 4294901760, %v1364_v28 }
  0x17   :  { %v126_v36 = vand.u32 4294901760, %v125_v29  ;;  %v132_v37 = vand.u32 4294901760, %v131_v30  ;;  %88 = vmatpush.msra.mxu0 %v1326_v9  ;;  %231 = vmatpush.msra.mxu2 %v1340_v16  ;;  %v1396_v44 = vand.u32 4294901760, %v67_v34  ;;  %v1399_v45 = vsub.f32 %v68_v21, %v1377_v32  ;;  %v60_v29 = vld [vmem:[#allocation2] sm:$0xff] }
  0x18   :  { %284 = vmatpush.msra.mxu3 %v1326_v9  ;;  %v138_v43 = vand.u32 4294901760, %v137_v31  ;;  %v1401_v46 = vand.u32 4294901760, %v66_v35  ;;  %v166_v48 = vand.u32 4294901760, %v1381_v33  ;;  %v144_v49 = vand.u32 4294901760, %v143_v38 }
  0x19   :  { %127 = vmatpush.msra.mxu1 %v126_v36  ;;  %90 = vmatpush.msra.mxu0 %v1328_v10  ;;  %v155_v50 = vsub.f32 %v1358_v25, %v154_v39  ;;  %v1411_v51 = vsub.f32 %v67_v34, %v1396_v44  ;;  %v1413_v52 = vand.u32 4294901760, %v65_v42  ;;  %v1415_v54 = vand.u32 4294901760, %v64_v47 }
  0x1a   :  { %234 = vmatpush.msra.mxu2 %v1346_v18  ;;  %286 = vmatpush.msra.mxu3 %v1328_v10  ;;  %v150_v55 = vand.u32 4294901760, %v149_v40  ;;  %v161_v56 = vsub.f32 %v1364_v28, %v160_v41  ;;  %v172_v57 = vand.u32 4294901760, %v1399_v45  ;;  %v1425_v58 = vsub.f32 %v66_v35, %v1401_v46 }
  0x1b   :  { %133 = vmatpush.msra.mxu1 %v132_v37  ;;  %92 = vmatpush.msra.mxu0 %v1330_v11  ;;  %v167_v59 = vsub.f32 %v1381_v33, %v166_v48  ;;  %v1430_v60 = vand.u32 4294901760, %v63_v53  ;;  %v156_v62 = vand.u32 4294901760, %v155_v50  ;;  %v178_v63 = vand.u32 4294901760, %v1411_v51 }
  0x1c   :  { %237 = vmatpush.msra.mxu2 %v1349_v19  ;;  %288 = vmatpush.msra.mxu3 %v1330_v11  ;;  %v1437_v0 = vsub.f32 %v65_v42, %v1413_v52  ;;  %v1440_v1 = vsub.f32 %v64_v47, %v1415_v54  ;;  %v162_v6 = vand.u32 4294901760, %v161_v56  ;;  %v173_v7 = vsub.f32 %v1399_v45, %v172_v57  ;;  %v432_v19 = vld [vmem:[#allocation5 + $0xc0] sm:$0xff] }
  0x1d   :  { %139 = vmatpush.msra.mxu1 %v138_v43  ;;  %94 = vmatpush.msra.mxu0 %v1342_v17  ;;  %v184_v8 = vand.u32 4294901760, %v1425_v58  ;;  %v1449_v12 = vand.u32 4294901760, %v62_v61  ;;  %v168_v13 = vand.u32 4294901760, %v167_v59  ;;  %v1452_v21 = vsub.f32 %v63_v53, %v1430_v60 }
  0x1e   :  { %240 = vmatpush.msra.mxu2 %v1358_v25  ;;  %290 = vmatpush.msra.mxu3 %v1342_v17  ;;  %v179_v30 = vsub.f32 %v1411_v51, %v178_v63  ;;  %v190_v31 = vand.u32 4294901760, %v1437_v0  ;;  %v1461_v34 = vand.u32 4294901760, %v61_v2  ;;  %v1463_v35 = vand.u32 4294901760, %v60_v29 }
  0x1f   :  { %145 = vmatpush.msra.mxu1 %v144_v49  ;;  %96 = vmatpush.msra.mxu0 %v1351_v20  ;;  %v196_v36 = vand.u32 4294901760, %v1440_v1  ;;  %v174_v37 = vand.u32 4294901760, %v173_v7  ;;  %v185_v38 = vsub.f32 %v1425_v58, %v184_v8  ;;  %v1473_v40 = vsub.f32 %v62_v61, %v1449_v12 }
  0x20   :  { %243 = vmatpush.msra.mxu2 %v1364_v28  ;;  %292 = vmatpush.msra.mxu3 %v1351_v20  ;;  %v114_v42 = vsub.f32 %v60_v29, %v1463_v35  ;;  %v180_v43 = vand.u32 4294901760, %v179_v30  ;;  %v191_v47 = vsub.f32 %v1437_v0, %v190_v31  ;;  %v202_v49 = vand.u32 4294901760, %v1452_v21 }
  0x21   :  { %151 = vmatpush.msra.mxu1 %v150_v55  ;;  %98 = vmatpush.msra.mxu0 %v1377_v32  ;;  %v1484_v50 = vsub.f32 %v61_v2, %v1461_v34  ;;  %v186_v53 = vand.u32 4294901760, %v185_v38  ;;  %v197_v55 = vsub.f32 %v1440_v1, %v196_v36  ;;  %v208_v56 = vand.u32 4294901760, %v1473_v40 }
  0x22   :  { %246 = vmatpush.msra.mxu2 %v1381_v33  ;;  %294 = vmatpush.msra.mxu3 %v1377_v32  ;;  %v115_v59 = vand.u32 4294901760, %v114_v42  ;;  %v192_v61 = vand.u32 4294901760, %v191_v47  ;;  %v437_v47 = vld [vmem:[#allocation5 + $0xe8] sm:$0xff]  ;;  %v1526_v15 = vand.u32 4294901760, %v439_v14  ;;  %v431_v33 = vld [vmem:[#allocation5 + $0xb8] sm:$0xff] }
  0x23   :  { %157 = vmatpush.msra.mxu1 %v156_v62  ;;  %100 = vmatpush.msra.mxu0 %v1396_v44  ;;  %v203_v62 = vsub.f32 %v1452_v21, %v202_v49  ;;  %v214_v2 = vand.u32 4294901760, %v1484_v50  ;;  %v209_v7 = vsub.f32 %v1473_v40, %v208_v56  ;;  %v1530_v16 = vand.u32 4294901760, %v437_v47 }
  0x24   :  { %249 = vmatpush.msra.mxu2 %v1399_v45  ;;  %296 = vmatpush.msra.mxu3 %v1396_v44  ;;  %v1605_v45 = vand.u32 4294901760, %v431_v33 }
  0x25   :  { %163 = vmatpush.msra.mxu1 %v162_v6  ;;  %102 = vmatpush.msra.mxu0 %v1401_v46  ;;  %v198_v6 = vand.u32 4294901760, %v197_v55  ;;  %v204_v29 = vand.u32 4294901760, %v203_v62  ;;  %v215_v30 = vsub.f32 %v1484_v50, %v214_v2 }
  0x26   :  { %252 = vmatpush.msra.mxu2 %v1411_v51  ;;  %298 = vmatpush.msra.mxu3 %v1401_v46  ;;  %v1620_v51 = vsub.f32 %v431_v33, %v1605_v45 }
  0x27   :  { %169 = vmatpush.msra.mxu1 %v168_v13  ;;  %104 = vmatpush.msra.mxu0 %v1413_v52  ;;  %v116_v13 = vsub.f32 %v114_v42, %v115_v59 }
  0x28   :  { %255 = vmatpush.msra.mxu2 %v1425_v58  ;;  %300 = vmatpush.msra.mxu3 %v1413_v52 }
  0x29   :  { %175 = vmatpush.msra.mxu1 %v174_v37  ;;  %106 = vmatpush.msra.mxu0 %v1415_v54  ;;  %v210_v37 = vand.u32 4294901760, %v209_v7  ;;  %v117_v38 = vand.u32 4294901760, %v116_v13  ;;  %v1566_v13 = vand.u32 4294901760, %v432_v19 }
  0x2a   :  { %258 = vmatpush.msra.mxu2 %v1437_v0  ;;  %302 = vmatpush.msra.mxu3 %v1415_v54  ;;  %v425_v0 = vld [vmem:[#allocation5 + $0x88] sm:$0xff] }
  0x2b   :  { %181 = vmatpush.msra.mxu1 %v180_v43  ;;  %108 = vmatpush.msra.mxu0 %v1430_v60  ;;  %v216_v43 = vand.u32 4294901760, %v215_v30 }
  0x2c   :  { %261 = vmatpush.msra.mxu2 %v1440_v1  ;;  %304 = vmatpush.msra.mxu3 %v1430_v60  ;;  %v424_v1 = vld [vmem:[#allocation5 + $0x80] sm:$0xff] }
  0x2d   :  { %187 = vmatpush.msra.mxu1 %v186_v53  ;;  %110 = vmatpush.msra.mxu0 %v1449_v12  ;;  %v434_v53 = vld [vmem:[#allocation5 + $0xd0] sm:$0xff] }
  0x2e   :  { %264 = vmatpush.msra.mxu2 %v1452_v21  ;;  %306 = vmatpush.msra.mxu3 %v1449_v12  ;;  %v1537_v55 = vand.u32 4294901760, %v434_v53 }
  0x2f   :  { %193 = vmatpush.msra.mxu1 %v192_v61  ;;  %112 = vmatpush.msra.mxu0 %v1461_v34  ;;  %v1549_v61 = vsub.f32 %v437_v47, %v1530_v16 }
  0x30   :  { %267 = vmatpush.msra.mxu2 %v1473_v40  ;;  %308 = vmatpush.msra.mxu3 %v1461_v34  ;;  %v1571_v30 = vsub.f32 %v434_v53, %v1537_v55 }
  0x31   :  { %319 = vmatpush.msrb.mxu0 %v124_v22  ;;  %199 = vmatpush.msra.mxu1 %v198_v6  ;;  %v438_v22 = vld [vmem:[#allocation5 + $0xf0] sm:$0xff]  ;;  %v500_v7 = vand.u32 4294901760, %v1549_v61 }
  0x32   :  { %270 = vmatpush.msra.mxu2 %v1484_v50  ;;  %312 = vmatmul.f32.vlgmr.msra.gmra.mxu3 %v115_v59 }
  0x33   :  { %323 = vmatpush.msrb.mxu0 %v130_v23  ;;  %205 = vmatpush.msra.mxu1 %v204_v29  ;;  %v1528_v23 = vand.u32 4294901760, %v438_v22 }
  0x34   :  { %273 = vmatmul.f32.vlgmr.msra.gmra.mxu2 %v114_v42  ;;  %118 = vmatmul.f32.vlgmr.msra.gmra.mxu0 %v117_v38  ;;  %v435_v42 = vld [vmem:[#allocation5 + $0xd8] sm:$0xff] }
  0x35   :  { %327 = vmatpush.msrb.mxu0 %v136_v24  ;;  %211 = vmatpush.msra.mxu1 %v210_v37  ;;  %v436_v24 = vld [vmem:[#allocation5 + $0xe0] sm:$0xff]  ;;  %v1546_v59 = vsub.f32 %v438_v22, %v1528_v23  ;;  %v501_v37 = vsub.f32 %v1549_v61, %v500_v7 }
  0x36   :  { %v1533_v18 = vand.u32 4294901760, %v436_v24  ;;  %446 = vmatpush.msrb.mxu2 %v1526_v15 }
  0x37   :  { %331 = vmatpush.msrb.mxu0 %v142_v26  ;;  %217 = vmatpush.msra.mxu1 %v216_v43  ;;  %v1535_v26 = vand.u32 4294901760, %v435_v42  ;;  %v1594_v43 = vsub.f32 %v432_v19, %v1566_v13  ;;  %v502_v53 = vand.u32 4294901760, %v501_v37 }
  0x38   :  { %219 = vmatmul.f32.vlgmr.msra.gmra.mxu1 %v1463_v35  ;;  %v1554_v6 = vsub.f32 %v436_v24, %v1533_v18  ;;  %448 = vmatpush.msrb.mxu2 %v1528_v23  ;;  %v518_v24 = vand.u32 4294901760, %v1571_v30 }
  0x39   :  { %386 = vmatpush.msrb.mxu1 %v1320_v3  ;;  %335 = vmatpush.msrb.mxu0 %v148_v27  ;;  %v433_v3 = vld [vmem:[#allocation5 + $0xc8] sm:$0xff]  ;;  %v1543_v27 = vsub.f32 %v439_v14, %v1526_v15 }
  0x3a   :  { %v1551_v62 = vand.u32 4294901760, %v433_v3  ;;  %v506_v29 = vand.u32 4294901760, %v1554_v6  ;;  %450 = vmatpush.msrb.mxu2 %v1530_v16  ;;  %v429_v14 = vld [vmem:[#allocation5 + $0xa8] sm:$0xff] }
  0x3b   :  { %388 = vmatpush.msrb.mxu1 %v1322_v4  ;;  %339 = vmatpush.msrb.mxu0 %v154_v39  ;;  %v1558_v4 = vsub.f32 %v435_v42, %v1535_v26  ;;  %v488_v25 = vand.u32 4294901760, %v1543_v27  ;;  %v494_v39 = vand.u32 4294901760, %v1546_v59  ;;  %v428_v42 = vld [vmem:[#allocation5 + $0xa0] sm:$0xff]  ;;  %v1613_v19 = vand.u32 4294901760, %v429_v14 }
  0x3c   :  { %v507_v47 = vsub.f32 %v1554_v6, %v506_v29  ;;  %452 = vmatpush.msrb.mxu2 %v1533_v18 }
  0x3d   :  { %390 = vmatpush.msrb.mxu1 %v1324_v5  ;;  %343 = vmatpush.msrb.mxu0 %v160_v41  ;;  %v489_v5 = vsub.f32 %v1543_v27, %v488_v25  ;;  %v495_v28 = vsub.f32 %v1546_v59, %v494_v39  ;;  %v1583_v41 = vsub.f32 %v433_v3, %v1551_v62 }
  0x3e   :  { %454 = vmatpush.msrb.mxu2 %v1535_v26 }
  0x3f   :  { %392 = vmatpush.msrb.mxu1 %v1326_v9  ;;  %347 = vmatpush.msrb.mxu0 %v166_v48  ;;  %v512_v9 = vand.u32 4294901760, %v1558_v4  ;;  %v430_v48 = vld [vmem:[#allocation5 + $0xb0] sm:$0xff]  ;;  %v490_v38 = vand.u32 4294901760, %v489_v5  ;;  %v496_v22 = vand.u32 4294901760, %v495_v28  ;;  %v508_v5 = vand.u32 4294901760, %v507_v47 }
  0x40   :  { %v519_v28 = vsub.f32 %v1571_v30, %v518_v24  ;;  %456 = vmatpush.msrb.mxu2 %v1537_v55 }
  0x41   :  { %394 = vmatpush.msrb.mxu1 %v1328_v10  ;;  %351 = vmatpush.msrb.mxu0 %v172_v57  ;;  %v524_v10 = vand.u32 4294901760, %v1583_v41  ;;  %v1607_v57 = vand.u32 4294901760, %v430_v48  ;;  %v513_v3 = vsub.f32 %v1558_v4, %v512_v9 }
  0x42   :  { %491 = vmatpush.msrb.mxu3 %v490_v38  ;;  %v536_v38 = vand.u32 4294901760, %v1620_v51  ;;  %458 = vmatpush.msrb.mxu2 %v1551_v62 }
  0x43   :  { %396 = vmatpush.msrb.mxu1 %v1330_v11  ;;  %355 = vmatpush.msrb.mxu0 %v178_v63  ;;  %v530_v11 = vand.u32 4294901760, %v1594_v43  ;;  %v427_v63 = vld [vmem:[#allocation5 + $0x98] sm:$0xff]  ;;  %v1627_v37 = vsub.f32 %v430_v48, %v1607_v57  ;;  %v525_v58 = vsub.f32 %v1583_v41, %v524_v10  ;;  %v514_v33 = vand.u32 4294901760, %v513_v3 }
  0x44   :  { %497 = vmatpush.msrb.mxu3 %v496_v22  ;;  %v1640_v48 = vsub.f32 %v429_v14, %v1613_v19  ;;  %v1642_v22 = vand.u32 4294901760, %v427_v63  ;;  %460 = vmatpush.msrb.mxu2 %v1566_v13 }
  0x45   :  { %398 = vmatpush.msrb.mxu1 %v1342_v17  ;;  %359 = vmatpush.msrb.mxu0 %v184_v8  ;;  %v1629_v17 = vand.u32 4294901760, %v428_v42  ;;  %v426_v8 = vld [vmem:[#allocation5 + $0x90] sm:$0xff]  ;;  %v542_v47 = vand.u32 4294901760, %v1627_v37 }
  0x46   :  { %503 = vmatpush.msrb.mxu3 %v502_v53  ;;  %v1655_v53 = vand.u32 4294901760, %v426_v8  ;;  %v548_v3 = vand.u32 4294901760, %v1640_v48  ;;  %462 = vmatpush.msrb.mxu2 %v1605_v45 }
  0x47   :  { %400 = vmatpush.msrb.mxu1 %v1351_v20  ;;  %363 = vmatpush.msrb.mxu0 %v190_v31  ;;  %v531_v20 = vsub.f32 %v1594_v43, %v530_v11  ;;  %v520_v31 = vand.u32 4294901760, %v519_v28  ;;  %v1653_v14 = vsub.f32 %v428_v42, %v1629_v17  ;;  %v1666_v42 = vsub.f32 %v427_v63, %v1642_v22 }
  0x48   :  { %509 = vmatpush.msrb.mxu3 %v508_v5  ;;  %v1668_v5 = vand.u32 4294901760, %v425_v0  ;;  %v543_v21 = vsub.f32 %v1627_v37, %v542_v47  ;;  %464 = vmatpush.msrb.mxu2 %v1607_v57  ;;  %v1679_v63 = vsub.f32 %v426_v8, %v1655_v53  ;;  %v1681_v28 = vand.u32 4294901760, %v424_v1 }
  0x49   :  { %402 = vmatpush.msrb.mxu1 %v1377_v32  ;;  %367 = vmatpush.msrb.mxu0 %v196_v36  ;;  %v526_v32 = vand.u32 4294901760, %v525_v58  ;;  %v537_v36 = vsub.f32 %v1620_v51, %v536_v38  ;;  %v549_v40 = vsub.f32 %v1640_v48, %v548_v3 }
  0x4a   :  { %515 = vmatpush.msrb.mxu3 %v514_v33  ;;  %v1692_v58 = vsub.f32 %v425_v0, %v1668_v5  ;;  %466 = vmatpush.msrb.mxu2 %v1613_v19  ;;  %v1702_v8 = vsub.f32 %v424_v1, %v1681_v28 }
  0x4b   :  { %404 = vmatpush.msrb.mxu1 %v1396_v44  ;;  %371 = vmatpush.msrb.mxu0 %v202_v49  ;;  %v532_v44 = vand.u32 4294901760, %v531_v20  ;;  %v554_v49 = vand.u32 4294901760, %v1653_v14 }
  0x4c   :  { %521 = vmatpush.msrb.mxu3 %v520_v31  ;;  %v572_v20 = vand.u32 4294901760, %v1692_v58  ;;  %468 = vmatpush.msrb.mxu2 %v1629_v17  ;;  %v578_v31 = vand.u32 4294901760, %v1702_v8 }
  0x4d   :  { %406 = vmatpush.msrb.mxu1 %v1401_v46  ;;  %375 = vmatpush.msrb.mxu0 %v208_v56  ;;  %v538_v46 = vand.u32 4294901760, %v537_v36  ;;  %v560_v56 = vand.u32 4294901760, %v1666_v42  ;;  %v555_v50 = vsub.f32 %v1653_v14, %v554_v49 }
  0x4e   :  { %527 = vmatpush.msrb.mxu3 %v526_v32  ;;  %470 = vmatpush.msrb.mxu2 %v1642_v22  ;;  %v573_v32 = vsub.f32 %v1692_v58, %v572_v20 }
  0x4f   :  { %408 = vmatpush.msrb.mxu1 %v1413_v52  ;;  %379 = vmatpush.msrb.mxu0 %v214_v2  ;;  %v544_v52 = vand.u32 4294901760, %v543_v21  ;;  %v566_v2 = vand.u32 4294901760, %v1679_v63  ;;  %v561_v33 = vsub.f32 %v1666_v42, %v560_v56  ;;  %v556_v0 = vand.u32 4294901760, %v555_v50 }
  0x50   :  { %381 = vmatmul.f32.vlgmr.msrb.gmra.mxu0 %v1463_v35  ;;  %533 = vmatpush.msrb.mxu3 %v532_v44 }
  0x51   :  { %410 = vmatpush.msrb.mxu1 %v1415_v54  ;;  %589 = vmatpush.msra.mxu0 %v1543_v27  ;;  %v550_v54 = vand.u32 4294901760, %v549_v40  ;;  %v794_v40 = vld [vmem:[#allocation5 + $0x130] sm:$0xff] }
  0x52   :  { %539 = vmatpush.msrb.mxu3 %v538_v46  ;;  %472 = vmatpush.msrb.mxu2 %v1655_v53  ;;  %v795_v46 = vld [vmem:[#allocation5 + $0x138] sm:$0xff] }
  0x53   :  { %412 = vmatpush.msrb.mxu1 %v1430_v60  ;;  %592 = vmatpush.msra.mxu0 %v1546_v59  ;;  %v567_v60 = vsub.f32 %v1679_v63, %v566_v2 }
  0x54   :  { %545 = vmatpush.msrb.mxu3 %v544_v52  ;;  %474 = vmatpush.msrb.mxu2 %v1668_v5 }
  0x55   :  { %414 = vmatpush.msrb.mxu1 %v1449_v12  ;;  %595 = vmatpush.msra.mxu0 %v1549_v61  ;;  %v562_v12 = vand.u32 4294901760, %v561_v33  ;;  %v568_v1 = vand.u32 4294901760, %v567_v60  ;;  %v803_v61 = vld [vmem:[#allocation5 + $0x178] sm:$0xff]  ;;  %v792_v33 = vld [vmem:[#allocation5 + $0x120] sm:$0xff]  ;;  %v1873_v60 = vand.u32 4294901760, %v795_v46 }
  0x56   :  { %551 = vmatpush.msrb.mxu3 %v550_v54  ;;  %476 = vmatpush.msrb.mxu2 %v1681_v28 }
  0x57   :  { %416 = vmatpush.msrb.mxu1 %v1461_v34  ;;  %598 = vmatpush.msra.mxu0 %v1554_v6  ;;  %v579_v34 = vsub.f32 %v1702_v8, %v578_v31  ;;  %v801_v6 = vld [vmem:[#allocation5 + $0x168] sm:$0xff] }
  0x58   :  { %418 = vmatmul.f32.vlgmr.msrb.gmra.mxu1 %v1463_v35  ;;  %557 = vmatpush.msrb.mxu3 %v556_v0  ;;  %v574_v35 = vand.u32 4294901760, %v573_v32 }
  0x59   :  { %642 = vmatpush.msra.mxu1 %v1526_v15  ;;  %601 = vmatpush.msra.mxu0 %v1558_v4  ;;  %v580_v36 = vand.u32 4294901760, %v579_v34  ;;  %v1806_v4 = vand.u32 4294901760, %v803_v61 }
  0x5a   :  { %563 = vmatpush.msrb.mxu3 %v562_v12  ;;  %683 = vmatpush.msra.mxu2 %v488_v25 }
  0x5b   :  { %644 = vmatpush.msra.mxu1 %v1528_v23  ;;  %604 = vmatpush.msra.mxu0 %v1571_v30 }
  0x5c   :  { %569 = vmatpush.msrb.mxu3 %v568_v1  ;;  %687 = vmatpush.msra.mxu2 %v494_v39  ;;  %v1810_v39 = vand.u32 4294901760, %v801_v6 }
  0x5d   :  { %646 = vmatpush.msra.mxu1 %v1530_v16  ;;  %607 = vmatpush.msra.mxu0 %v1583_v41 }
  0x5e   :  { %575 = vmatpush.msrb.mxu3 %v574_v35  ;;  %691 = vmatpush.msra.mxu2 %v500_v7  ;;  %v800_v7 = vld [vmem:[#allocation5 + $0x160] sm:$0xff]  ;;  %v791_v35 = vld [vmem:[#allocation5 + $0x118] sm:$0xff] }
  0x5f   :  { %648 = vmatpush.msra.mxu1 %v1533_v18  ;;  %610 = vmatpush.msra.mxu0 %v1594_v43  ;;  %v1812_v41 = vand.u32 4294901760, %v800_v7 }
  0x60   :  { %581 = vmatpush.msrb.mxu3 %v580_v36  ;;  %695 = vmatpush.msra.mxu2 %v506_v29  ;;  %v798_v29 = vld [vmem:[#allocation5 + $0x150] sm:$0xff] }
  0x61   :  { %650 = vmatpush.msra.mxu1 %v1535_v26  ;;  %613 = vmatpush.msra.mxu0 %v1620_v51  ;;  %v1816_v43 = vand.u32 4294901760, %v798_v29 }
  0x62   :  { %750 = vmatpush.msra.mxu3 %v1526_v15  ;;  %699 = vmatpush.msra.mxu2 %v512_v9  ;;  %v1178_v15 = vld [vmem:[#allocation7] ss:$0 sm:$0xff] }
  0x63   :  { %652 = vmatpush.msra.mxu1 %v1537_v55  ;;  %616 = vmatpush.msra.mxu0 %v1627_v37  ;;  %v1831_v37 = vsub.f32 %v800_v7, %v1812_v41 }
  0x64   :  { %752 = vmatpush.msra.mxu3 %v1528_v23  ;;  %703 = vmatpush.msra.mxu2 %v518_v24  ;;  %v797_v24 = vld [vmem:[#allocation5 + $0x148] sm:$0xff] }
  0x65   :  { %654 = vmatpush.msra.mxu1 %v1551_v62  ;;  %619 = vmatpush.msra.mxu0 %v1640_v48  ;;  %v1828_v51 = vand.u32 4294901760, %v797_v24 }
  0x66   :  { %754 = vmatpush.msra.mxu3 %v1530_v16  ;;  %707 = vmatpush.msra.mxu2 %v524_v10  ;;  %v796_v10 = vld [vmem:[#allocation5 + $0x140] sm:$0xff] }
  0x67   :  { %656 = vmatpush.msra.mxu1 %v1566_v13  ;;  %622 = vmatpush.msra.mxu0 %v1653_v14  ;;  %v1839_v48 = vand.u32 4294901760, %v796_v10 }
  0x68   :  { %756 = vmatpush.msra.mxu3 %v1533_v18  ;;  %711 = vmatpush.msra.mxu2 %v530_v11  ;;  %v1825_v11 = vsub.f32 %v801_v6, %v1810_v39 }
  0x69   :  { %658 = vmatpush.msra.mxu1 %v1605_v45  ;;  %625 = vmatpush.msra.mxu0 %v1666_v42  ;;  %v1847_v42 = vsub.f32 %v797_v24, %v1828_v51 }
  0x6a   :  { %758 = vmatpush.msra.mxu3 %v1535_v26  ;;  %715 = vmatpush.msra.mxu2 %v536_v38  ;;  %v1837_v38 = vsub.f32 %v798_v29, %v1816_v43  ;;  %v864_v14 = vand.u32 4294901760, %v1825_v11 }
  0x6b   :  { %660 = vmatpush.msra.mxu1 %v1607_v57  ;;  %628 = vmatpush.msra.mxu0 %v1679_v63  ;;  %v888_v54 = vand.u32 4294901760, %v1847_v42 }
  0x6c   :  { %760 = vmatpush.msra.mxu3 %v1537_v55  ;;  %719 = vmatpush.msra.mxu2 %v542_v47  ;;  %v865_v21 = vsub.f32 %v1825_v11, %v864_v14  ;;  %v882_v63 = vand.u32 4294901760, %v1837_v38 }
  0x6d   :  { %662 = vmatpush.msra.mxu1 %v1613_v19  ;;  %631 = vmatpush.msra.mxu0 %v1692_v58 }
  0x6e   :  { %762 = vmatpush.msra.mxu3 %v1551_v62  ;;  %723 = vmatpush.msra.mxu2 %v548_v3  ;;  %v802_v62 = vld [vmem:[#allocation5 + $0x170] sm:$0xff]  ;;  %v870_v3 = vand.u32 4294901760, %v1831_v37  ;;  %v883_v32 = vsub.f32 %v1837_v38, %v882_v63 }
  0x6f   :  { %664 = vmatpush.msra.mxu1 %v1629_v17  ;;  %634 = vmatpush.msra.mxu0 %v1702_v8  ;;  %v1808_v25 = vand.u32 4294901760, %v802_v62 }
  0x70   :  { %764 = vmatpush.msra.mxu3 %v1566_v13  ;;  %727 = vmatpush.msra.mxu2 %v554_v49  ;;  %v799_v13 = vld [vmem:[#allocation5 + $0x158] sm:$0xff]  ;;  %v871_v50 = vsub.f32 %v1831_v37, %v870_v3  ;;  %v884_v6 = vand.u32 4294901760, %v883_v32 }
  0x71   :  { %666 = vmatpush.msra.mxu1 %v1642_v22  ;;  %v1814_v9 = vand.u32 4294901760, %v799_v13  ;;  %810 = vmatpush.msrb.mxu0 %v1806_v4 }
  0x72   :  { %766 = vmatpush.msra.mxu3 %v1605_v45  ;;  %731 = vmatpush.msra.mxu2 %v560_v56  ;;  %v872_v36 = vand.u32 4294901760, %v871_v50 }
  0x73   :  { %668 = vmatpush.msra.mxu1 %v1655_v53  ;;  %812 = vmatpush.msrb.mxu0 %v1808_v25 }
  0x74   :  { %768 = vmatpush.msra.mxu3 %v1607_v57  ;;  %735 = vmatpush.msra.mxu2 %v566_v2  ;;  %v1819_v57 = vsub.f32 %v803_v61, %v1806_v4  ;;  %v793_v2 = vld [vmem:[#allocation5 + $0x128] sm:$0xff]  ;;  %v1900_v61 = vand.u32 4294901760, %v791_v35 }
  0x75   :  { %670 = vmatpush.msra.mxu1 %v1668_v5  ;;  %814 = vmatpush.msrb.mxu0 %v1810_v39  ;;  %v1881_v34 = vand.u32 4294901760, %v793_v2 }
  0x76   :  { %770 = vmatpush.msra.mxu3 %v1613_v19  ;;  %739 = vmatpush.msra.mxu2 %v572_v20  ;;  %v1822_v19 = vsub.f32 %v802_v62, %v1808_v25  ;;  %v866_v20 = vand.u32 4294901760, %v865_v21 }
  0x77   :  { %672 = vmatpush.msra.mxu1 %v1681_v28  ;;  %816 = vmatpush.msrb.mxu0 %v1812_v41 }
  0x78   :  { %772 = vmatpush.msra.mxu3 %v1629_v17  ;;  %743 = vmatpush.msra.mxu2 %v578_v31  ;;  %v1834_v17 = vsub.f32 %v799_v13, %v1814_v9  ;;  %v858_v47 = vand.u32 4294901760, %v1822_v19  ;;  %v1875_v31 = vand.u32 4294901760, %v794_v40 }
  0x79   :  { %818 = vmatpush.msrb.mxu0 %v1814_v9 }
  0x7a   :  { %774 = vmatpush.msra.mxu3 %v1642_v22  ;;  %v852_v22 = vand.u32 4294901760, %v1819_v57  ;;  %v859_v44 = vsub.f32 %v1822_v19, %v858_v47  ;;  %v876_v49 = vand.u32 4294901760, %v1834_v17 }
  0x7b   :  { %820 = vmatpush.msrb.mxu0 %v1816_v43 }
  0x7c   :  { %776 = vmatpush.msra.mxu3 %v1655_v53  ;;  %v860_v52 = vand.u32 4294901760, %v859_v44  ;;  %v877_v0 = vsub.f32 %v1834_v17, %v876_v49 }
  0x7d   :  { %822 = vmatpush.msrb.mxu0 %v1828_v51 }
  0x7e   :  { %778 = vmatpush.msra.mxu3 %v1668_v5  ;;  %v853_v5 = vsub.f32 %v1819_v57, %v852_v22 }
  0x7f   :  { %824 = vmatpush.msrb.mxu0 %v1839_v48 }
  0x80   :  { %780 = vmatpush.msra.mxu3 %v1681_v28  ;;  %v1862_v28 = vsub.f32 %v796_v10, %v1839_v48  ;;  %v854_v58 = vand.u32 4294901760, %v853_v5 }
  0x81   :  { %826 = vmatpush.msrb.mxu0 %v1873_v60 }
  0x82   :  { %855 = vmatpush.msrb.mxu1 %v854_v58  ;;  %v894_v1 = vand.u32 4294901760, %v1862_v28 }
  0x83   :  { %828 = vmatpush.msrb.mxu0 %v1875_v31 }
  0x84   :  { %861 = vmatpush.msrb.mxu1 %v860_v52  ;;  %v895_v7 = vsub.f32 %v1862_v28, %v894_v1 }
  0x85   :  { %830 = vmatpush.msrb.mxu0 %v1881_v34 }
  0x86   :  { %867 = vmatpush.msrb.mxu1 %v866_v20  ;;  %v896_v44 = vand.u32 4294901760, %v895_v7 }
  0x88   :  { %873 = vmatpush.msrb.mxu1 %v872_v36 }
  0xb1   :  { %v119_v23 = vpop.f32.mrf.mxu0 }
  0xb2   :  { %v120_v16 = vadd.f32 %v1178_v15, %v119_v23  ;;  %v1884_v15 = vsub.f32 %v795_v46, %v1873_v60  ;;  %v1888_v23 = vsub.f32 %v794_v40, %v1875_v31 }
  0xb4   :  { %v906_v13 = vand.u32 4294901760, %v1888_v23 }
  0xb5   :  { %v220_v18 = vpop.f32.mrf.mxu1  ;;  %v313_v59 = vpop.f32.mrf.mxu3 }
  0xb6   :  { %v221_v26 = vadd.f32 %v220_v18, %v120_v16  ;;  %v1890_v16 = vand.u32 4294901760, %v792_v33  ;;  %v907_v21 = vsub.f32 %v1888_v23, %v906_v13 }
  0xb7   :  { %v274_v55 = vpop.f32.mrf.mxu2 }
  0xb8   :  { %v275_v27 = vadd.f32 %v274_v55, %v221_v26  ;;  %v889_v26 = vsub.f32 %v1847_v42, %v888_v54  ;;  %v878_v55 = vand.u32 4294901760, %v877_v0  ;;  %v1908_v29 = vsub.f32 %v792_v33, %v1890_v16  ;;  %832 = vmatpush.msrb.mxu0 %v1890_v16 }
  0xb9   :  { %v908_v50 = vand.u32 4294901760, %v907_v21 }
  0xba   :  { %v314_v30 = vadd.f32 %v313_v59, %v275_v27  ;;  %v900_v27 = vand.u32 4294901760, %v1884_v15  ;;  %v1898_v59 = vsub.f32 %v793_v2, %v1881_v34  ;;  %879 = vmatpush.msrb.mxu1 %v878_v55  ;;  %v890_v24 = vand.u32 4294901760, %v889_v26  ;;  %834 = vmatpush.msrb.mxu0 %v1900_v61  ;;  %v788_v26 = vld [vmem:[#allocation5 + $0x100] sm:$0xff] }
  0xbb   :  { %v918_v46 = vand.u32 4294901760, %v1908_v29 }
  0xbc   :  { %v901_v10 = vsub.f32 %v1884_v15, %v900_v27  ;;  %885 = vmatpush.msrb.mxu1 %v884_v6  ;;  %v839_v6 = vand.u32 4294901760, %v788_v26 }
  0xbd   :  { %v919_v2 = vsub.f32 %v1908_v29, %v918_v46 }
  0xbe   :  { %891 = vmatpush.msrb.mxu1 %v890_v24  ;;  %v941_v24 = vsub.f32 %v788_v26, %v839_v6 }
  0xbf   :  { %v920_v20 = vand.u32 4294901760, %v919_v2 }
  0xc0   :  { %897 = vmatpush.msrb.mxu1 %v896_v44  ;;  %v942_v44 = vand.u32 4294901760, %v941_v24 }
  0xcd   :  { %v382_v45 = vpop.f32.mrf.mxu0 }
  0xce   :  { %v383_v53 = vadd.f32 %v382_v45, %v314_v30  ;;  %v912_v45 = vand.u32 4294901760, %v1898_v59 }
  0xd0   :  { %v913_v58 = vsub.f32 %v1898_v59, %v912_v45 }
  0xd5   :  { %v419_v56 = vpop.f32.mrf.mxu1 }
  0xd6   :  { %v420_v8 = vadd.f32 %v419_v56, %v383_v53  ;;  %v1917_v53 = vsub.f32 %v791_v35, %v1900_v61  ;;  %v902_v56 = vand.u32 4294901760, %v901_v10  ;;  %v789_v35 = vld [vmem:[#allocation5 + $0x108] sm:$0xff] }
  0xd8   :  { %v422_v12 = vmax.f32 %v420_v8, 0.0  ;;  %v924_v52 = vand.u32 4294901760, %v1917_v53  ;;  %903 = vmatpush.msrb.mxu1 %v902_v56  ;;  %v914_v8 = vand.u32 4294901760, %v913_v58 }
  0xda   :  { %v477_v18 = vand.u32 4294901760, %v422_v12  ;;  %v925_v33 = vsub.f32 %v1917_v53, %v924_v52  ;;  %909 = vmatpush.msrb.mxu1 %v908_v50 }
  0xdc   :  { %v478_v62 = vsub.f32 %v422_v12, %v477_v18  ;;  %583 = vmatmul.f32.vlgmr.msrb.gmra.mxu3 %v477_v18  ;;  %915 = vmatpush.msrb.mxu1 %v914_v8  ;;  %v926_v0 = vand.u32 4294901760, %v925_v33  ;;  %v790_v12 = vld [vmem:[#allocation5 + $0x110] sm:$0xff] }
  0xdd   :  { %1006 = vmatpush.msrb.mxu3 %v1806_v4  ;;  %v835_v32 = vand.u32 4294901760, %v790_v12 }
  0xde   :  { %637 = vmatmul.f32.vlgmr.msra.gmra.mxu0 %v478_v62  ;;  %v479_v30 = vand.u32 4294901760, %v478_v62  ;;  %921 = vmatpush.msrb.mxu1 %v920_v20 }
  0xdf   :  { %1008 = vmatpush.msrb.mxu3 %v1808_v25  ;;  %v929_v36 = vsub.f32 %v790_v12, %v835_v32  ;;  %836 = vmatpush.msrb.mxu0 %v835_v32 }
  0xe0   :  { %676 = vmatmul.f32.vlgmr.msra.gmra.mxu1 %v479_v30  ;;  %v480_v5 = vsub.f32 %v478_v62, %v479_v30 }
  0xe1   :  { %1010 = vmatpush.msrb.mxu3 %v1810_v39  ;;  %927 = vmatpush.msrb.mxu1 %v926_v0  ;;  %v930_v55 = vand.u32 4294901760, %v929_v36 }
  0xe2   :  { %v481_v40 = vand.u32 4294901760, %v480_v5 }
  0xe3   :  { %1012 = vmatpush.msrb.mxu3 %v1812_v41  ;;  %v931_v7 = vsub.f32 %v929_v36, %v930_v55 }
  0xe4   :  { %482 = vmatmul.f32.vlgmr.msrb.gmra.mxu2 %v481_v40  ;;  %782 = vmatmul.f32.vlgmr.msra.gmra.mxu3 %v477_v18  ;;  %v943_v40 = vsub.f32 %v941_v24, %v942_v44 }
  0xe5   :  { %953 = vmatpush.msrb.mxu2 %v1819_v57  ;;  %1014 = vmatpush.msrb.mxu3 %v1814_v9  ;;  %v932_v10 = vand.u32 4294901760, %v931_v7 }
  0xe6   :  { %v944_v56 = vand.u32 4294901760, %v943_v40 }
  0xe7   :  { %956 = vmatpush.msrb.mxu2 %v1822_v19  ;;  %1016 = vmatpush.msrb.mxu3 %v1816_v43 }
  0xe8   :  { %933 = vmatpush.msrb.mxu1 %v932_v10 }
  0xe9   :  { %959 = vmatpush.msrb.mxu2 %v1825_v11  ;;  %1018 = vmatpush.msrb.mxu3 %v1828_v51 }
  0xeb   :  { %962 = vmatpush.msrb.mxu2 %v1831_v37  ;;  %1020 = vmatpush.msrb.mxu3 %v1839_v48 }
  0xec   :  { %745 = vmatmul.f32.vlgmr.msra.gmra.mxu2 %v477_v18  ;;  %v837_v18 = vand.u32 4294901760, %v789_v35 }
  0xed   :  { %965 = vmatpush.msrb.mxu2 %v1834_v17  ;;  %1022 = vmatpush.msrb.mxu3 %v1873_v60 }
  0xee   :  { %v935_v62 = vsub.f32 %v789_v35, %v837_v18  ;;  %838 = vmatpush.msrb.mxu0 %v837_v18 }
  0xef   :  { %968 = vmatpush.msrb.mxu2 %v1837_v38  ;;  %1024 = vmatpush.msrb.mxu3 %v1875_v31 }
  0xf0   :  { %v936_v30 = vand.u32 4294901760, %v935_v62  ;;  %840 = vmatpush.msrb.mxu0 %v839_v6 }
  0xf1   :  { %971 = vmatpush.msrb.mxu2 %v1847_v42  ;;  %1026 = vmatpush.msrb.mxu3 %v1881_v34 }
  0xf2   :  { %1047 = vmatpush.msra.mxu0 %v852_v22  ;;  %v937_v5 = vsub.f32 %v935_v62, %v936_v30 }
  0xf3   :  { %974 = vmatpush.msrb.mxu2 %v1862_v28  ;;  %1028 = vmatpush.msrb.mxu3 %v1890_v16 }
  0xf4   :  { %1051 = vmatpush.msra.mxu0 %v858_v47  ;;  %v938_v21 = vand.u32 4294901760, %v937_v5 }
  0xf5   :  { %977 = vmatpush.msrb.mxu2 %v1884_v15  ;;  %1030 = vmatpush.msrb.mxu3 %v1900_v61 }
  0xf6   :  { %1055 = vmatpush.msra.mxu0 %v864_v14  ;;  %939 = vmatpush.msrb.mxu1 %v938_v21 }
  0xf7   :  { %980 = vmatpush.msrb.mxu2 %v1888_v23  ;;  %1032 = vmatpush.msrb.mxu3 %v835_v32 }
  0xf8   :  { %1059 = vmatpush.msra.mxu0 %v870_v3  ;;  %945 = vmatpush.msrb.mxu1 %v944_v56 }
  0xf9   :  { %983 = vmatpush.msrb.mxu2 %v1898_v59  ;;  %1034 = vmatpush.msrb.mxu3 %v837_v18 }
  0xfa   :  { %1114 = vmatpush.msra.mxu1 %v1806_v4  ;;  %1063 = vmatpush.msra.mxu0 %v876_v49  ;;  %v1179_v4 = vld [vmem:[#allocation7 + $0x1] ss:$0 sm:$0xff]  ;;  %v1180_v49 = vld [vmem:[#allocation7 + $0x2] ss:$0 sm:$0xff] }
  0xfb   :  { %986 = vmatpush.msrb.mxu2 %v1908_v29  ;;  %1036 = vmatpush.msrb.mxu3 %v839_v6 }
  0xfc   :  { %1116 = vmatpush.msra.mxu1 %v1808_v25  ;;  %1067 = vmatpush.msra.mxu0 %v882_v63 }
  0xfd   :  { %989 = vmatpush.msrb.mxu2 %v1917_v53 }
  0xfe   :  { %1118 = vmatpush.msra.mxu1 %v1810_v39  ;;  %1071 = vmatpush.msra.mxu0 %v888_v54 }
  0xff   :  { %992 = vmatpush.msrb.mxu2 %v929_v36 }
 0x100   :  { %1120 = vmatpush.msra.mxu1 %v1812_v41  ;;  %1075 = vmatpush.msra.mxu0 %v894_v1 }
 0x101   :  { %995 = vmatpush.msrb.mxu2 %v935_v62 }
 0x102   :  { %1122 = vmatpush.msra.mxu1 %v1814_v9  ;;  %1079 = vmatpush.msra.mxu0 %v900_v27 }
 0x103   :  { %998 = vmatpush.msrb.mxu2 %v941_v24 }
 0x104   :  { %1124 = vmatpush.msra.mxu1 %v1816_v43  ;;  %1083 = vmatpush.msra.mxu0 %v906_v13 }
 0x106   :  { %1126 = vmatpush.msra.mxu1 %v1828_v51  ;;  %1087 = vmatpush.msra.mxu0 %v912_v45 }
 0x108   :  { %1128 = vmatpush.msra.mxu1 %v1839_v48  ;;  %1091 = vmatpush.msra.mxu0 %v918_v46 }
 0x10a   :  { %1130 = vmatpush.msra.mxu1 %v1873_v60  ;;  %1095 = vmatpush.msra.mxu0 %v924_v52 }
 0x10c   :  { %1132 = vmatpush.msra.mxu1 %v1875_v31  ;;  %1099 = vmatpush.msra.mxu0 %v930_v55 }
 0x10e   :  { %1134 = vmatpush.msra.mxu1 %v1881_v34  ;;  %1103 = vmatpush.msra.mxu0 %v936_v30 }
 0x110   :  { %1136 = vmatpush.msra.mxu1 %v1890_v16  ;;  %1107 = vmatpush.msra.mxu0 %v942_v44 }
 0x112   :  { %1138 = vmatpush.msra.mxu1 %v1900_v61 }
 0x114   :  { %1140 = vmatpush.msra.mxu1 %v835_v32 }
 0x116   :  { %1142 = vmatpush.msra.mxu1 %v837_v18 }
 0x118   :  { %1144 = vmatpush.msra.mxu1 %v839_v6 }
 0x15b   :  { %v638_v43 = vpop.f32.mrf.mxu0 }
 0x15d   :  { %v677_v19 = vpop.f32.mrf.mxu1 }
 0x15f   :  { %v584_v25 = vpop.f32.mrf.mxu3 }
 0x167   :  { %v483_v39 = vpop.f32.mrf.mxu2  ;;  %v783_v17 = vpop.f32.mrf.mxu3 }
 0x168   :  { %v484_v41 = vadd.f32 %v1179_v4, %v483_v39 }
 0x16a   :  { %v585_v9 = vadd.f32 %v584_v25, %v484_v41 }
 0x16c   :  { %v639_v57 = vadd.f32 %v638_v43, %v585_v9 }
 0x16e   :  { %v678_v11 = vadd.f32 %v677_v19, %v639_v57 }
 0x16f   :  { %v746_v51 = vpop.f32.mrf.mxu2 }
 0x170   :  { %v747_v37 = vadd.f32 %v746_v51, %v678_v11 }
 0x172   :  { %v784_v38 = vadd.f32 %v783_v17, %v747_v37 }
 0x174   :  { %v786_v48 = vmax.f32 %v784_v38, 0.0 }
 0x176   :  { %v841_v22 = vand.u32 4294901760, %v786_v48 }
 0x178   :  { %v842_v47 = vsub.f32 %v786_v48, %v841_v22  ;;  %947 = vmatmul.f32.vlgmr.msrb.gmra.mxu1 %v841_v22 }
 0x17a   :  { %1001 = vmatmul.f32.vlgmr.msrb.gmra.mxu2 %v842_v47  ;;  %v843_v14 = vand.u32 4294901760, %v842_v47 }
 0x17c   :  { %1040 = vmatmul.f32.vlgmr.msrb.gmra.mxu3 %v843_v14  ;;  %v844_v3 = vsub.f32 %v842_v47, %v843_v14 }
 0x17e   :  { %v845_v42 = vand.u32 4294901760, %v844_v3 }
 0x180   :  { %846 = vmatmul.f32.vlgmr.msrb.gmra.mxu0 %v845_v42  ;;  %1146 = vmatmul.f32.vlgmr.msra.gmra.mxu1 %v841_v22 }
 0x188   :  { %1109 = vmatmul.f32.vlgmr.msra.gmra.mxu0 %v841_v22 }
 0x1f5   :  { %v948_v63 = vpop.f32.mrf.mxu1 }
 0x1fd   :  { %v847_v28 = vpop.f32.mrf.mxu0  ;;  %v1002_v31 = vpop.f32.mrf.mxu2 }
 0x1fe   :  { %v848_v54 = vadd.f32 %v1180_v49, %v847_v28  ;;  %v1147_v27 = vpop.f32.mrf.mxu1 }
 0x1ff   :  { %v1041_v34 = vpop.f32.mrf.mxu3 }
 0x200   :  { %v949_v60 = vadd.f32 %v948_v63, %v848_v54 }
 0x202   :  { %v1003_v1 = vadd.f32 %v1002_v31, %v949_v60 }
 0x204   :  { %v1042_v15 = vadd.f32 %v1041_v34, %v1003_v1 }
 0x205   :  { %v1110_v23 = vpop.f32.mrf.mxu0 }
 0x206   :  { %v1111_v16 = vadd.f32 %v1110_v23, %v1042_v15 }
 0x208   :  { %v1148_v59 = vadd.f32 %v1147_v27, %v1111_v16 }
 0x20a   :  { %v1150_v61 = vmax.f32 %v1148_v59, 0.0 }
 0x20c   :  { %1151 = vst [vmem:[#allocation8] sm:$0xff] %v1150_v61 }
 0x20d   :  { %1162 = dma.vmem_to_hbm [thread:$0]  %s1158_s2, 128, %s1160_s5, [#allocation4]  }
 0x20e   :  { %1281 = dma.done.wait [#allocation4], 128  }
 0x20f   :  { %1282 = vsyncadd [#allocation4], 4294967168 }
 0x210   :  { %1167 = vsyncpa [#allocation3], 1 }
 0x211   :  { %1168 = vsyncpa [#allocation6], 1 }
 0x212   :  { %1169 = vsyncpa [#allocation4], 1 }

</bundles_post_ra>
